<compile_context>
chip_gen: v6e
topology: v6e:2x2x1
jax: 0.10.0
libtpu: 0.0.40
codegen_flags: <defaults>
</compile_context>

<pallas_src>
import functools
import math
from abc import ABC, abstractmethod
from typing import List, Optional, Tuple

import jax
import jax.numpy as jnp
from jax.experimental import pallas as pl
from jax.experimental.pallas import tpu as pltpu


def _round_up(x: int, m: int) -> int:
    return ((x + m - 1) // m) * m


def _forward_kernel(x_ref, o_ref, *, eval_block, negate):
    """BaseTestProblem.forward kernel for one (TB, d) batch-row tile.

    x_ref: (TB, d) input block  -- batch rows on sublanes, feature dim on lanes.
    o_ref: (TB, 1) output block -- small column store (1/d of input traffic).
    """
    x = x_ref[...].astype(jnp.float32)     # accumulate in f32
    f = eval_block(x)                      # (TB, 1) f32, noise-free evaluation
    if negate:
        f = -f                             # free VPU negate, fused with store
    o_ref[...] = f.astype(o_ref.dtype)


class BaseTestProblemPallas(ABC):
    """Pallas/JAX port of botorch BaseTestProblem (forward-pass semantics)."""

    dim: int
    _bounds: List[Tuple[float, float]]
    _check_grad_at_opt: bool = True

    # Largest batch-row tile per grid step and the VMEM accounting used to cap
    # it.  A (TB, d) f32 tile is lane-padded to round_up(d, 128) lanes in VMEM,
    # so the budget divides by ~6 block-sized buffers (2x double-buffered
    # input, 2x double-buffered output, ~2x compute temporaries).
    _max_batch_tile: int = 32768
    _vmem_block_budget_bytes: int = 36 * 1024 * 1024
    _vmem_limit_bytes: int = 48 * 1024 * 1024  # < 64 MiB physical on v7x

    def __init__(self, noise_std: Optional[float] = None, negate: bool = False) -> None:
        if len(self._bounds) != self.dim:
            raise ValueError(
                "Expected the bounds to match the dimensionality of the domain. "
                f"Got self.dim={self.dim!r} and len(self._bounds)={len(self._bounds)!r}."
            )
        self.noise_std = noise_std
        self.negate = negate
        # (2, dim) bounds buffer, wrapper-side only (unused by forward, so it
        # is intentionally never passed to pallas_call).
        # TODO(synk): torch registers this buffer as float64; JAX defaults to
        # float32 unless x64 is enabled, so bounds are kept in float32 here.
        self.bounds = jnp.asarray(self._bounds, dtype=jnp.float32).T

    # ---- abstract "evaluate_true", expressed as a per-block function --------
    @staticmethod
    @abstractmethod
    def evaluate_true_block(x: jnp.ndarray) -> jnp.ndarray:
        """Map an f32 (TB, d) block to an f32 (TB, 1) block of noise-free evals."""

    # ---- BaseTestProblem.forward --------------------------------------------
    def forward(self, X, noise: bool = True, *, seed: int = 0):
        X = jnp.asarray(X)
        batch = X.ndim > 1
        X2 = X if batch else X[None, :]
        if X2.shape[-1] != self.dim:
            raise ValueError(f"Expected last dim {self.dim}, got {X2.shape[-1]}.")

        batch_shape = X2.shape[:-1]
        d = self.dim
        B = math.prod(batch_shape)
        Xf = X2.reshape(B, d)  # zero-copy collapse of leading dims; no transpose

        # --- tile sizing: VMEM-budgeted row tiles; >=2 grid steps for large B
        lanes_pad = _round_up(d, 128)              # VMEM lane padding of minor dim
        bytes_per_row = lanes_pad * 4              # conservative (f32) per-row cost
        tb_cap = self._vmem_block_budget_bytes // (6 * bytes_per_row)
        tb_cap = max(128, (tb_cap // 128) * 128)
        if B <= 1024:
            TB = B                                 # single block: dims == array dims
        else:
            half = _round_up(-(-B // 2), 128)      # keep >=2 steps (v7x megacore)
            TB = min(self._max_batch_tile, tb_cap, half)
        grid_n = pl.cdiv(B, TB)                    # ragged tail handled by Pallas

        kernel = functools.partial(
            _forward_kernel,
            eval_block=self.evaluate_true_block,
            negate=self.negate,
        )
        itemsize = jnp.dtype(Xf.dtype).itemsize
        cost = pl.CostEstimate(
            flops=2 * B * d,
            transcendentals=0,
            bytes_accessed=B * d * itemsize + B * itemsize,
        )
        out = pl.pallas_call(
            kernel,
            out_shape=jax.ShapeDtypeStruct((B, 1), Xf.dtype),
            grid=(grid_n,),
            in_specs=[pl.BlockSpec((TB, d), lambda i: (i, 0))],
            out_specs=pl.BlockSpec((TB, 1), lambda i: (i, 0)),
            compiler_params=pltpu.CompilerParams(
                dimension_semantics=("parallel",),
                vmem_limit_bytes=self._vmem_limit_bytes,
            ),
            cost_estimate=cost,
        )(Xf)

        f = out[:, 0].reshape(batch_shape)

        # Observation noise (before negation in botorch).  The kernel already
        # applied the negation, so add sign * noise_std * z on the tiny
        # (B,)-sized output: -(f_true + s*z) == kernel_out - s*z.
        # TODO(synk): matches torch.randn_like in distribution, not in the
        # exact random stream of torch's global generator.
        eff_noise_std = self.noise_std if (noise and self.noise_std is not None) else None
        if eff_noise_std is not None:
            z = jax.random.normal(jax.random.PRNGKey(seed), f.shape, dtype=jnp.float32)
            sign = -1.0 if self.negate else 1.0
            f = f + (sign * float(eff_noise_std)) * z.astype(f.dtype)

        return f if batch else jnp.squeeze(f, axis=0)

    __call__ = forward


class SpherePallas(BaseTestProblemPallas):
    """Concrete test problem: Sphere, f(x) = sum_i x_i^2."""

    dim = 6
    _bounds = [(-5.12, 5.12)] * 6

    @staticmethod
    def evaluate_true_block(x: jnp.ndarray) -> jnp.ndarray:
        # x: (TB, d) f32 -> (TB, 1) f32.  VPU mul + lane (XLU) reduce; no MXU.
        return jnp.sum(x * x, axis=-1, keepdims=True)


if __name__ == "__main__":
    key = jax.random.PRNGKey(0)
    d = SpherePallas.dim  # 6
    X = jax.random.normal(key, (2, 4, d), dtype=jnp.float32)  # batch_shape x d
    ref = jnp.sum(X.astype(jnp.float32) ** 2, axis=-1)

    # 1) noiseless, non-negated: exact match vs jnp reference.
    prob = SpherePallas(noise_std=None, negate=False)
    y = prob(X)
    jax.block_until_ready(y)
    assert y.shape == (2, 4), y.shape
    assert jnp.allclose(y, ref, rtol=1e-5, atol=1e-5)

    # 2) 1-D input path: (d,) -> scalar (unsqueeze / squeeze semantics).
    x1 = X[0, 0]
    y1 = prob(x1)
    jax.block_until_ready(y1)
    assert y1.shape == (), y1.shape
    assert jnp.allclose(y1, ref[0, 0], rtol=1e-5, atol=1e-5)

    # 3) noisy + negated path (noise applied before negation).
    prob_n = SpherePallas(noise_std=0.1, negate=True)
    y2 = prob_n(X, seed=123)
    jax.block_until_ready(y2)
    assert y2.shape == (2, 4), y2.shape
    assert bool(jnp.all(jnp.isfinite(y2)))
    assert float(jnp.max(jnp.abs(-y2 - ref))) < 2.0  # |noise| well below 20 sigma

    # 4) forward(..., noise=False) overrides noise_std: exact negated values.
    y3 = prob_n(X, noise=False)
    jax.block_until_ready(y3)
    assert jnp.allclose(y3, -ref, rtol=1e-5, atol=1e-5)

    print("KERNEL_OK")
</pallas_src>

<mosaic_0001>
module attributes {stable_mosaic.version = 11 : i64} {
  func.func @_forward_kernel(%arg0: i32, %arg1: memref<8x6xf32, #tpu.memory_space<vmem>>, %arg2: memref<8x1xf32, #tpu.memory_space<vmem>>) attributes {dimension_semantics = [#tpu.dimension_semantics<parallel>], iteration_bounds = array<i64: 1>, scalar_prefetch = 0 : i64, scratch_operands = 0 : i64, tpu.core_type = #tpu.core_type<tc>, window_params = [{transform_indices = @transform_0, window_bounds = array<i64: 8, 6>}, {transform_indices = @transform_1, window_bounds = array<i64: 8, 1>}]} {
    %c0 = arith.constant 0 : index
    %c0_0 = arith.constant 0 : index
    %0 = vector.load %arg1[%c0, %c0_0] : memref<8x6xf32, #tpu.memory_space<vmem>>, vector<8x6xf32>
    %1 = arith.mulf %0, %0 : vector<8x6xf32>
    %cst = arith.constant dense<0.000000e+00> : vector<8xf32>
    %2 = vector.multi_reduction <add>, %1, %cst [1] : vector<8x6xf32> to vector<8xf32>
    %3 = vector.shape_cast %2 : vector<8xf32> to vector<8x1xf32>
    %c0_1 = arith.constant 0 : index
    %c0_2 = arith.constant 0 : index
    %4 = vector.load %arg2[%c0_1, %c0_2] : memref<8x1xf32, #tpu.memory_space<vmem>>, vector<8x1xf32>
    tpu.vector_store %arg2[%c0_1, %c0_2], %3 {strides = array<i32>} : memref<8x1xf32, #tpu.memory_space<vmem>>, vector<8x1xf32>,
    return
  }
  func.func @transform_0(%arg0: i32) -> (i32, i32) {
    %c0_i32 = arith.constant 0 : i32
    %c0_i32_0 = arith.constant 0 : i32
    return %arg0, %c0_i32 : i32, i32
  }
  func.func @transform_1(%arg0: i32) -> (i32, i32) {
    %c0_i32 = arith.constant 0 : i32
    %c0_i32_0 = arith.constant 0 : i32
    return %arg0, %c0_i32 : i32, i32
  }
}

</mosaic_0001>

<bundles_post_ra>
// kernel: tpu_custom_call.1
= control target key start
LH: loop header
LB: loop body
LE: loop exit
PB: predicated region body
PF: predicated region fallthrough
CT: control target
= control target key end

     0   :  { %6 = vsyncpa [#allocation3], 0  ;;  %s56_s6 = smov [#allocation2]   ;;  %s73_s0 = inlined_call_operand.hbm [shape: f32[8,6], index: 0, kind: input, shape index: {}]   ;;  %s74_s1 = inlined_call_operand.vmem [shape: f32[8,1], index: 1, kind: output, shape index: {}]  }
   0x1   :  { %s13_s7 = sshll.u32 %s56_s6, 4  ;;  %s14_s7 = int_to_ptr.vmem [resolvable:$true] %s13_s7 }
   0x2   :  { %s42_s8 = scalar_lea.vmem %s14_s7, 128  ;;  %p47_p1 = scmp.lt.s32.totalorder %s14_s7, %s14_s7 }
   0x3   :  { %p43_p0 = scmp.ne.s32.totalorder %s14_s7, %s42_s8  ;;  %p48_p2 = scmp.lt.s32.totalorder %s42_s8, %s42_s8 }
   0x5   :  { %p49_p3 = por %p48_p2, %p47_p1 }
   0x7   :  { %p50_p4 = pnand %p49_p3, %p43_p0 }
   0x9   :  { %53 = shalt.err (!%p50_p4)
}
   0xa   :  { %16 = dma.hbm_to_vmem [thread:$0]  %s73_s0, 128, %s14_s7, [#allocation3]  }
   0xb   :  { %54 = dma.done.wait [#allocation3], 128  }
   0xc   :  { %55 = vsyncadd [#allocation3], 4294967168  ;;  %v20_v0 = vld [vmem:[#allocation2] sm:$0xff]  ;;  %vm22_vm0 = vcmask 48128   ;;  %vm26_vm1 = vcmask 7168  }
   0xd   :  { %v21_v1 = vmul.f32 %v20_v0, %v20_v0 }
   0xf   :  { %v23_v2 = vsel %vm22_vm0, %v21_v1, 0.0 }
  0x10   :  { %24 = vadd.xlane.f32.xlu0 %v23_v2 }
  0x99   :  { %v25_v3 = vpop.xlane.xlu0 %24 }
  0x9a   :  { %27 = vst.msk [vmem:[%s74_s1] sm:$0xff] %vm26_vm1, %v25_v3 }
  0x9b   :  { %32 = vsyncpa [#allocation3], 1 }

</bundles_post_ra>
